<compile_context>
chip_gen: v5e
topology: v5e:2x2
jax: 0.10.0
libtpu: 0.0.40
codegen_flags: <defaults>
</compile_context>

<pallas_src>
import math

import jax
import jax.numpy as jnp
from jax.experimental import pallas as pl
from jax.experimental.pallas import tpu as pltpu

# ---- model hyper-parameters (small, consistent with the module) ----
BATCH = 2
SEQ = 8
D_MODEL = 32
N_HEADS = 4
D_HEAD = D_MODEL // N_HEADS
D_FF = 64
EPS = 1e-6
NEG_INF = -1e9


def _layer_norm(x, gamma, beta):
    # Tutorial LayerNormalisation: alpha * (x - mean) / (std + eps) + bias,
    # std unbiased (divide by n-1), eps added to std (not var).
    n = x.shape[-1]
    mean = jnp.mean(x, axis=-1, keepdims=True)
    var = jnp.sum((x - mean) ** 2, axis=-1, keepdims=True) * (1.0 / (n - 1))
    std = jnp.sqrt(var)
    return gamma * (x - mean) / (std + EPS) + beta


# ------------------------- fully fused encoder-block kernel -------------------------
def encoder_block_kernel(x_ref, mask_ref, vec_ref, wblob_ref, w2_ref, out_ref):
    B, S = mask_ref.shape
    D = out_ref.shape[1]
    H, Dh, FF = N_HEADS, D_HEAD, D_FF

    x2 = x_ref[...]                                        # (B*S, D) f32

    # ---- packed per-channel params: one DMA, static row/lane slices ----
    g1 = vec_ref[0:1, 0:D]
    b1 = vec_ref[1:2, 0:D]
    bqkv = vec_ref[2:3, 0:3 * D]
    bo = vec_ref[3:4, 0:D]
    g2 = vec_ref[4:5, 0:D]
    b2 = vec_ref[5:6, 0:D]
    bf1 = vec_ref[6:7, 0:FF]
    bf2 = vec_ref[7:8, 0:D]

    # ---------------- self-attention sublayer: x + Wo(MHA(LN1(x))) ----------------
    xn = _layer_norm(x2, g1, b1)
    # fused Q|K|V projection: bf16 MXU operands, f32 accumulation
    qkv = jnp.dot(xn.astype(jnp.bfloat16), wblob_ref[:, 0:3 * D],
                  preferred_element_type=jnp.float32) + bqkv      # (B*S, 3D) f32

    scale = 1.0 / math.sqrt(Dh)
    q = qkv[:, 0 * D:1 * D] * scale                               # scale folded once
    k = qkv[:, 1 * D:2 * D]
    v = qkv[:, 2 * D:3 * D]

    def split_heads(t):
        # (B*S, D) -> (H*B, S, Dh) head-major batch; 2-D lane slices + leading-dim
        # concat/reshape only (no 4-D transpose).
        return jnp.concatenate(
            [t[:, h * Dh:(h + 1) * Dh] for h in range(H)], axis=0
        ).reshape(H * B, S, Dh)

    qh = split_heads(q).astype(jnp.bfloat16)
    kh = split_heads(k).astype(jnp.bfloat16)
    vh = split_heads(v).astype(jnp.bfloat16)

    # additive mask bias, computed once and replicated over heads
    bias = jnp.where(mask_ref[...] > 0.0, 0.0, NEG_INF)           # (B, S)
    bias = jnp.broadcast_to(bias.reshape(B, 1, S), (B, S, S))
    bias = jnp.concatenate([bias] * H, axis=0)                    # (H*B, S, S)

    # all heads in one batched einsum pair
    scores = jnp.einsum('bqd,bkd->bqk', qh, kh,
                        preferred_element_type=jnp.float32) + bias
    scores = scores - jnp.max(scores, axis=-1, keepdims=True)
    p = jnp.exp(scores)
    # approx reciprocal rides the otherwise idle EUP slot (~1e-3 rel. error vs. divide)
    p = p * pl.reciprocal(jnp.sum(p, axis=-1, keepdims=True), approx=True)

    ctx = jnp.einsum('bqk,bkd->bqd', p.astype(jnp.bfloat16), vh,
                     preferred_element_type=jnp.float32)          # (H*B, S, Dh)
    ctx = ctx.reshape(H, B * S, Dh)
    attn = jnp.concatenate([ctx[h] for h in range(H)], axis=-1)   # (B*S, D)

    attn_out = jnp.dot(attn.astype(jnp.bfloat16), wblob_ref[:, 3 * D:4 * D],
                       preferred_element_type=jnp.float32) + bo
    x2 = x2 + attn_out

    # ---------------- feed-forward sublayer: x + W2(relu(W1(LN2(x)))) ----------------
    xn2 = _layer_norm(x2, g2, b2)
    h1 = jnp.maximum(
        jnp.dot(xn2.astype(jnp.bfloat16), wblob_ref[:, 4 * D:4 * D + FF],
                preferred_element_type=jnp.float32) + bf1,
        0.0)
    ff = jnp.dot(h1.astype(jnp.bfloat16), w2_ref[...],
                 preferred_element_type=jnp.float32) + bf2

    out_ref[...] = x2 + ff


# ------------------------------- wrapper -------------------------------
def pack_params(params):
    """Pack 12 small tensors into 3 kernel operands (fewer DMAs / descriptors)."""
    g1, b1, wqkv, bqkv, wo, bo, g2, b2, w1, bf1, w2, bf2 = params
    width = 3 * D_MODEL

    def row(v):
        v = v.reshape(1, -1)
        return jnp.pad(v, ((0, 0), (0, width - v.shape[1])))

    vec_blob = jnp.concatenate(
        [row(g1), row(b1), row(bqkv), row(bo),
         row(g2), row(b2), row(bf1), row(bf2)], axis=0).astype(jnp.float32)
    w_blob = jnp.concatenate([wqkv, wo, w1], axis=1).astype(jnp.bfloat16)  # (D, 192)
    w2b = w2.astype(jnp.bfloat16)                                          # (FF, D)
    return vec_blob, w_blob, w2b


def encoder_block(x, mask, params):
    B, S, D = x.shape
    vec_blob, w_blob, w2b = pack_params(params)

    # layout plumbing stays on the XLA side (free); kernel sees lane-dense 2-D slabs
    x2d = x.reshape(B * S, D)
    mask2d = mask.reshape(B, S)

    vmem = lambda: pl.BlockSpec(memory_space=pltpu.MemorySpace.VMEM)
    out2d = pl.pallas_call(
        encoder_block_kernel,
        out_shape=jax.ShapeDtypeStruct((B * S, D), jnp.float32),
        in_specs=[vmem() for _ in range(5)],
        out_specs=vmem(),
    )(x2d, mask2d, vec_blob, w_blob, w2b)
    return out2d.reshape(B, S, D)


# ----------------------- deterministic parameter init -----------------------
def init_params(key):
    def dense(k, shape):
        return jax.random.normal(k, shape, jnp.float32) * 0.02

    ks = jax.random.split(key, 4)
    params = [
        jnp.ones((1, D_MODEL), jnp.float32),            # LN1 alpha
        jnp.zeros((1, D_MODEL), jnp.float32),           # LN1 bias
        dense(ks[0], (D_MODEL, 3 * D_MODEL)),           # fused Wq|Wk|Wv
        jnp.zeros((1, 3 * D_MODEL), jnp.float32),       # fused bq|bk|bv
        dense(ks[1], (D_MODEL, D_MODEL)),               # Wo
        jnp.zeros((1, D_MODEL), jnp.float32),           # bo
        jnp.ones((1, D_MODEL), jnp.float32),            # LN2 alpha
        jnp.zeros((1, D_MODEL), jnp.float32),           # LN2 bias
        dense(ks[2], (D_MODEL, D_FF)),                  # W1
        jnp.zeros((1, D_FF), jnp.float32),              # b1
        dense(ks[3], (D_FF, D_MODEL)),                  # W2
        jnp.zeros((1, D_MODEL), jnp.float32),           # b2
    ]
    return params


if __name__ == "__main__":
    key = jax.random.PRNGKey(0)
    kx, kp = jax.random.split(key)

    x = jax.random.normal(kx, (BATCH, SEQ, D_MODEL), jnp.float32)
    mask = jnp.ones((BATCH, 1, SEQ), jnp.float32)
    mask = mask.at[1, 0, SEQ - 2:].set(0.0)   # mask last 2 key positions of batch 1

    params = init_params(kp)

    out = encoder_block(x, mask, params)
    out = jax.block_until_ready(out)
    assert out.shape == (BATCH, SEQ, D_MODEL)
    assert bool(jnp.all(jnp.isfinite(out)))
    print("KERNEL_OK")
</pallas_src>

<mosaic_0001>
module attributes {stable_mosaic.version = 11 : i64} {
  func.func @encoder_block_kernel(%arg0: memref<16x32xf32, #tpu.memory_space<vmem>>, %arg1: memref<2x8xf32, #tpu.memory_space<vmem>>, %arg2: memref<8x96xf32, #tpu.memory_space<vmem>>, %arg3: memref<32x192xbf16, #tpu.memory_space<vmem>>, %arg4: memref<64x32xbf16, #tpu.memory_space<vmem>>, %arg5: memref<16x32xf32, #tpu.memory_space<vmem>>) attributes {dimension_semantics = [], scalar_prefetch = 0 : i64, scratch_operands = 0 : i64, tpu.core_type = #tpu.core_type<tc>} {
    %c0 = arith.constant 0 : index
    %c0_0 = arith.constant 0 : index
    %0 = vector.load %arg0[%c0, %c0_0] : memref<16x32xf32, #tpu.memory_space<vmem>>, vector<16x32xf32>
    %c0_1 = arith.constant 0 : index
    %c0_2 = arith.constant 0 : index
    %1 = vector.load %arg2[%c0_1, %c0_2] : memref<8x96xf32, #tpu.memory_space<vmem>>, vector<1x32xf32>
    %c1 = arith.constant 1 : index
    %c0_3 = arith.constant 0 : index
    %2 = vector.load %arg2[%c1, %c0_3] : memref<8x96xf32, #tpu.memory_space<vmem>>, vector<1x32xf32>
    %c2 = arith.constant 2 : index
    %c0_4 = arith.constant 0 : index
    %3 = vector.load %arg2[%c2, %c0_4] : memref<8x96xf32, #tpu.memory_space<vmem>>, vector<1x96xf32>
    %c3 = arith.constant 3 : index
    %c0_5 = arith.constant 0 : index
    %4 = vector.load %arg2[%c3, %c0_5] : memref<8x96xf32, #tpu.memory_space<vmem>>, vector<1x32xf32>
    %c4 = arith.constant 4 : index
    %c0_6 = arith.constant 0 : index
    %5 = vector.load %arg2[%c4, %c0_6] : memref<8x96xf32, #tpu.memory_space<vmem>>, vector<1x32xf32>
    %c5 = arith.constant 5 : index
    %c0_7 = arith.constant 0 : index
    %6 = vector.load %arg2[%c5, %c0_7] : memref<8x96xf32, #tpu.memory_space<vmem>>, vector<1x32xf32>
    %c6 = arith.constant 6 : index
    %c0_8 = arith.constant 0 : index
    %7 = vector.load %arg2[%c6, %c0_8] : memref<8x96xf32, #tpu.memory_space<vmem>>, vector<1x64xf32>
    %c7 = arith.constant 7 : index
    %c0_9 = arith.constant 0 : index
    %8 = vector.load %arg2[%c7, %c0_9] : memref<8x96xf32, #tpu.memory_space<vmem>>, vector<1x32xf32>
    %cst = arith.constant dense<0.000000e+00> : vector<16xf32>
    %9 = vector.multi_reduction <add>, %0, %cst [1] : vector<16x32xf32> to vector<16xf32>
    %10 = vector.shape_cast %9 : vector<16xf32> to vector<16x1xf32>
    %cst_10 = arith.constant 3.200000e+01 : f32
    %11 = vector.broadcast %cst_10 : f32 to vector<16x1xf32>
    %12 = arith.divf %10, %11 : vector<16x1xf32>
    %13 = vector.broadcast %12 : vector<16x1xf32> to vector<16x32xf32>
    %14 = arith.subf %0, %13 : vector<16x32xf32>
    %15 = arith.mulf %14, %14 : vector<16x32xf32>
    %cst_11 = arith.constant dense<0.000000e+00> : vector<16xf32>
    %16 = vector.multi_reduction <add>, %15, %cst_11 [1] : vector<16x32xf32> to vector<16xf32>
    %17 = vector.shape_cast %16 : vector<16xf32> to vector<16x1xf32>
    %cst_12 = arith.constant 0.0322580636 : f32
    %18 = vector.broadcast %cst_12 : f32 to vector<16x1xf32>
    %19 = arith.mulf %17, %18 : vector<16x1xf32>
    %20 = math.sqrt %19 : vector<16x1xf32>
    %21 = vector.broadcast %12 : vector<16x1xf32> to vector<16x32xf32>
    %22 = arith.subf %0, %21 : vector<16x32xf32>
    %23 = vector.broadcast %1 : vector<1x32xf32> to vector<16x32xf32>
    %24 = arith.mulf %23, %22 : vector<16x32xf32>
    %cst_13 = arith.constant 9.99999997E-7 : f32
    %25 = vector.broadcast %cst_13 : f32 to vector<16x1xf32>
    %26 = arith.addf %20, %25 : vector<16x1xf32>
    %27 = vector.broadcast %26 : vector<16x1xf32> to vector<16x32xf32>
    %28 = arith.divf %24, %27 : vector<16x32xf32>
    %29 = vector.broadcast %2 : vector<1x32xf32> to vector<16x32xf32>
    %30 = arith.addf %28, %29 : vector<16x32xf32>
    %31 = arith.truncf %30 : vector<16x32xf32> to vector<16x32xbf16>
    %c0_14 = arith.constant 0 : index
    %c0_15 = arith.constant 0 : index
    %32 = vector.load %arg3[%c0_14, %c0_15] : memref<32x192xbf16, #tpu.memory_space<vmem>>, vector<32x96xbf16>
    %cst_16 = arith.constant dense<0.000000e+00> : vector<16x96xf32>
    %33 = tpu.matmul %31, %32, %cst_16 {dimension_numbers = #tpu.dot_dimension_numbers<[1], [0], [0], [1], [0, 0, 1, 1], [], []>} : vector<16x32xbf16>, vector<32x96xbf16>, vector<16x96xf32> -> vector<16x96xf32>
    %34 = vector.broadcast %3 : vector<1x96xf32> to vector<16x96xf32>
    %35 = arith.addf %33, %34 : vector<16x96xf32>
    %36 = vector.extract_strided_slice %35 {offsets = [0, 0], sizes = [16, 32], strides = [1, 1]} : vector<16x96xf32> to vector<16x32xf32>
    %cst_17 = arith.constant 0.353553385 : f32
    %37 = vector.broadcast %cst_17 : f32 to vector<16x32xf32>
    %38 = arith.mulf %36, %37 : vector<16x32xf32>
    %39 = vector.extract_strided_slice %35 {offsets = [0, 32], sizes = [16, 32], strides = [1, 1]} : vector<16x96xf32> to vector<16x32xf32>
    %40 = vector.extract_strided_slice %35 {offsets = [0, 64], sizes = [16, 32], strides = [1, 1]} : vector<16x96xf32> to vector<16x32xf32>
    %41 = vector.extract_strided_slice %38 {offsets = [0, 0], sizes = [16, 8], strides = [1, 1]} : vector<16x32xf32> to vector<16x8xf32>
    %42 = vector.extract_strided_slice %38 {offsets = [0, 8], sizes = [16, 8], strides = [1, 1]} : vector<16x32xf32> to vector<16x8xf32>
    %43 = vector.extract_strided_slice %38 {offsets = [0, 16], sizes = [16, 8], strides = [1, 1]} : vector<16x32xf32> to vector<16x8xf32>
    %44 = vector.extract_strided_slice %38 {offsets = [0, 24], sizes = [16, 8], strides = [1, 1]} : vector<16x32xf32> to vector<16x8xf32>
    %45 = tpu.concatenate %41, %42, %43, %44 in 0 : vector<16x8xf32>, vector<16x8xf32>, vector<16x8xf32>, vector<16x8xf32> -> vector<64x8xf32>
    %46 = vector.shape_cast %45 : vector<64x8xf32> to vector<8x8x8xf32>
    %47 = arith.truncf %46 : vector<8x8x8xf32> to vector<8x8x8xbf16>
    %48 = vector.extract_strided_slice %39 {offsets = [0, 0], sizes = [16, 8], strides = [1, 1]} : vector<16x32xf32> to vector<16x8xf32>
    %49 = vector.extract_strided_slice %39 {offsets = [0, 8], sizes = [16, 8], strides = [1, 1]} : vector<16x32xf32> to vector<16x8xf32>
    %50 = vector.extract_strided_slice %39 {offsets = [0, 16], sizes = [16, 8], strides = [1, 1]} : vector<16x32xf32> to vector<16x8xf32>
    %51 = vector.extract_strided_slice %39 {offsets = [0, 24], sizes = [16, 8], strides = [1, 1]} : vector<16x32xf32> to vector<16x8xf32>
    %52 = tpu.concatenate %48, %49, %50, %51 in 0 : vector<16x8xf32>, vector<16x8xf32>, vector<16x8xf32>, vector<16x8xf32> -> vector<64x8xf32>
    %53 = vector.shape_cast %52 : vector<64x8xf32> to vector<8x8x8xf32>
    %54 = arith.truncf %53 : vector<8x8x8xf32> to vector<8x8x8xbf16>
    %55 = vector.extract_strided_slice %40 {offsets = [0, 0], sizes = [16, 8], strides = [1, 1]} : vector<16x32xf32> to vector<16x8xf32>
    %56 = vector.extract_strided_slice %40 {offsets = [0, 8], sizes = [16, 8], strides = [1, 1]} : vector<16x32xf32> to vector<16x8xf32>
    %57 = vector.extract_strided_slice %40 {offsets = [0, 16], sizes = [16, 8], strides = [1, 1]} : vector<16x32xf32> to vector<16x8xf32>
    %58 = vector.extract_strided_slice %40 {offsets = [0, 24], sizes = [16, 8], strides = [1, 1]} : vector<16x32xf32> to vector<16x8xf32>
    %59 = tpu.concatenate %55, %56, %57, %58 in 0 : vector<16x8xf32>, vector<16x8xf32>, vector<16x8xf32>, vector<16x8xf32> -> vector<64x8xf32>
    %60 = vector.shape_cast %59 : vector<64x8xf32> to vector<8x8x8xf32>
    %61 = arith.truncf %60 : vector<8x8x8xf32> to vector<8x8x8xbf16>
    %c0_18 = arith.constant 0 : index
    %c0_19 = arith.constant 0 : index
    %62 = vector.load %arg1[%c0_18, %c0_19] : memref<2x8xf32, #tpu.memory_space<vmem>>, vector<2x8xf32>
    %cst_20 = arith.constant 0.000000e+00 : f32
    %63 = vector.broadcast %cst_20 : f32 to vector<2x8xf32>
    %64 = arith.cmpf ogt, %62, %63 : vector<2x8xf32>
    %cst_21 = arith.constant 0.000000e+00 : f32
    %cst_22 = arith.constant -1.000000e+09 : f32
    %65 = vector.broadcast %cst_21 : f32 to vector<2x8xf32>
    %66 = vector.broadcast %cst_22 : f32 to vector<2x8xf32>
    %67 = arith.select %64, %65, %66 : vector<2x8xi1>, vector<2x8xf32>
    %68 = vector.shape_cast %67 : vector<2x8xf32> to vector<2x1x8xf32>
    %69 = vector.shape_cast %68 : vector<2x1x8xf32> to vector<2x1x8xf32>
    %70 = vector.broadcast %69 : vector<2x1x8xf32> to vector<2x8x8xf32>
    %71 = tpu.concatenate %70, %70, %70, %70 in 0 : vector<2x8x8xf32>, vector<2x8x8xf32>, vector<2x8x8xf32>, vector<2x8x8xf32> -> vector<8x8x8xf32>
    "tpu.trace_start"() <{level = 10 : i32, message = "bqd,bkd->bqk"}> : () -> ()
    %cst_23 = arith.constant dense<0.000000e+00> : vector<8x8x8xf32>
    %72 = tpu.matmul %47, %54, %cst_23 {dimension_numbers = #tpu.dot_dimension_numbers<[2], [2], [1], [1], [0, 0, 0, 1, 1, 1], [0], [0]>} : vector<8x8x8xbf16>, vector<8x8x8xbf16>, vector<8x8x8xf32> -> vector<8x8x8xf32>
    "tpu.trace_stop"() : () -> ()
    %73 = arith.addf %72, %71 : vector<8x8x8xf32>
    %cst_24 = arith.constant dense<0xFF800000> : vector<8x8xf32>
    %74 = vector.multi_reduction <maximumf>, %73, %cst_24 [2] : vector<8x8x8xf32> to vector<8x8xf32>
    %75 = vector.shape_cast %74 : vector<8x8xf32> to vector<8x8x1xf32>
    %76 = vector.broadcast %75 : vector<8x8x1xf32> to vector<8x8x8xf32>
    %77 = arith.subf %73, %76 : vector<8x8x8xf32>
    %78 = math.exp %77 : vector<8x8x8xf32>
    %cst_25 = arith.constant dense<0.000000e+00> : vector<8x8xf32>
    %79 = vector.multi_reduction <add>, %78, %cst_25 [2] : vector<8x8x8xf32> to vector<8x8xf32>
    %80 = vector.shape_cast %79 : vector<8x8xf32> to vector<8x8x1xf32>
    %81 = tpu.reciprocal %80 {approx = true} : vector<8x8x1xf32> -> vector<8x8x1xf32>
    %82 = vector.broadcast %81 : vector<8x8x1xf32> to vector<8x8x8xf32>
    %83 = arith.mulf %78, %82 : vector<8x8x8xf32>
    %84 = arith.truncf %83 : vector<8x8x8xf32> to vector<8x8x8xbf16>
    "tpu.trace_start"() <{level = 10 : i32, message = "bqk,bkd->bqd"}> : () -> ()
    %cst_26 = arith.constant dense<0.000000e+00> : vector<8x8x8xf32>
    %85 = tpu.matmul %84, %61, %cst_26 {dimension_numbers = #tpu.dot_dimension_numbers<[2], [1], [1], [2], [0, 0, 0, 1, 1, 2], [0], [0]>} : vector<8x8x8xbf16>, vector<8x8x8xbf16>, vector<8x8x8xf32> -> vector<8x8x8xf32>
    "tpu.trace_stop"() : () -> ()
    %86 = vector.shape_cast %85 : vector<8x8x8xf32> to vector<4x16x8xf32>
    %87 = vector.extract_strided_slice %86 {offsets = [0, 0, 0], sizes = [1, 16, 8], strides = [1, 1, 1]} : vector<4x16x8xf32> to vector<1x16x8xf32>
    %88 = vector.shape_cast %87 : vector<1x16x8xf32> to vector<16x8xf32>
    %89 = vector.extract_strided_slice %86 {offsets = [1, 0, 0], sizes = [1, 16, 8], strides = [1, 1, 1]} : vector<4x16x8xf32> to vector<1x16x8xf32>
    %90 = vector.shape_cast %89 : vector<1x16x8xf32> to vector<16x8xf32>
    %91 = vector.extract_strided_slice %86 {offsets = [2, 0, 0], sizes = [1, 16, 8], strides = [1, 1, 1]} : vector<4x16x8xf32> to vector<1x16x8xf32>
    %92 = vector.shape_cast %91 : vector<1x16x8xf32> to vector<16x8xf32>
    %93 = vector.extract_strided_slice %86 {offsets = [3, 0, 0], sizes = [1, 16, 8], strides = [1, 1, 1]} : vector<4x16x8xf32> to vector<1x16x8xf32>
    %94 = vector.shape_cast %93 : vector<1x16x8xf32> to vector<16x8xf32>
    %95 = tpu.concatenate %88, %90, %92, %94 in 1 : vector<16x8xf32>, vector<16x8xf32>, vector<16x8xf32>, vector<16x8xf32> -> vector<16x32xf32>
    %96 = arith.truncf %95 : vector<16x32xf32> to vector<16x32xbf16>
    %c0_27 = arith.constant 0 : index
    %c96 = arith.constant 96 : index
    %97 = vector.load %arg3[%c0_27, %c96] : memref<32x192xbf16, #tpu.memory_space<vmem>>, vector<32x32xbf16>
    %cst_28 = arith.constant dense<0.000000e+00> : vector<16x32xf32>
    %98 = tpu.matmul %96, %97, %cst_28 {dimension_numbers = #tpu.dot_dimension_numbers<[1], [0], [0], [1], [0, 0, 1, 1], [], []>} : vector<16x32xbf16>, vector<32x32xbf16>, vector<16x32xf32> -> vector<16x32xf32>
    %99 = vector.broadcast %4 : vector<1x32xf32> to vector<16x32xf32>
    %100 = arith.addf %98, %99 : vector<16x32xf32>
    %101 = arith.addf %0, %100 : vector<16x32xf32>
    %cst_29 = arith.constant dense<0.000000e+00> : vector<16xf32>
    %102 = vector.multi_reduction <add>, %101, %cst_29 [1] : vector<16x32xf32> to vector<16xf32>
    %103 = vector.shape_cast %102 : vector<16xf32> to vector<16x1xf32>
    %cst_30 = arith.constant 3.200000e+01 : f32
    %104 = vector.broadcast %cst_30 : f32 to vector<16x1xf32>
    %105 = arith.divf %103, %104 : vector<16x1xf32>
    %106 = vector.broadcast %105 : vector<16x1xf32> to vector<16x32xf32>
    %107 = arith.subf %101, %106 : vector<16x32xf32>
    %108 = arith.mulf %107, %107 : vector<16x32xf32>
    %cst_31 = arith.constant dense<0.000000e+00> : vector<16xf32>
    %109 = vector.multi_reduction <add>, %108, %cst_31 [1] : vector<16x32xf32> to vector<16xf32>
    %110 = vector.shape_cast %109 : vector<16xf32> to vector<16x1xf32>
    %cst_32 = arith.constant 0.0322580636 : f32
    %111 = vector.broadcast %cst_32 : f32 to vector<16x1xf32>
    %112 = arith.mulf %110, %111 : vector<16x1xf32>
    %113 = math.sqrt %112 : vector<16x1xf32>
    %114 = vector.broadcast %105 : vector<16x1xf32> to vector<16x32xf32>
    %115 = arith.subf %101, %114 : vector<16x32xf32>
    %116 = vector.broadcast %5 : vector<1x32xf32> to vector<16x32xf32>
    %117 = arith.mulf %116, %115 : vector<16x32xf32>
    %cst_33 = arith.constant 9.99999997E-7 : f32
    %118 = vector.broadcast %cst_33 : f32 to vector<16x1xf32>
    %119 = arith.addf %113, %118 : vector<16x1xf32>
    %120 = vector.broadcast %119 : vector<16x1xf32> to vector<16x32xf32>
    %121 = arith.divf %117, %120 : vector<16x32xf32>
    %122 = vector.broadcast %6 : vector<1x32xf32> to vector<16x32xf32>
    %123 = arith.addf %121, %122 : vector<16x32xf32>
    %124 = arith.truncf %123 : vector<16x32xf32> to vector<16x32xbf16>
    %c0_34 = arith.constant 0 : index
    %c128 = arith.constant 128 : index
    %125 = vector.load %arg3[%c0_34, %c128] : memref<32x192xbf16, #tpu.memory_space<vmem>>, vector<32x64xbf16>
    %cst_35 = arith.constant dense<0.000000e+00> : vector<16x64xf32>
    %126 = tpu.matmul %124, %125, %cst_35 {dimension_numbers = #tpu.dot_dimension_numbers<[1], [0], [0], [1], [0, 0, 1, 1], [], []>} : vector<16x32xbf16>, vector<32x64xbf16>, vector<16x64xf32> -> vector<16x64xf32>
    %127 = vector.broadcast %7 : vector<1x64xf32> to vector<16x64xf32>
    %128 = arith.addf %126, %127 : vector<16x64xf32>
    %cst_36 = arith.constant 0.000000e+00 : f32
    %129 = vector.broadcast %cst_36 : f32 to vector<16x64xf32>
    %130 = arith.maximumf %128, %129 : vector<16x64xf32>
    %131 = arith.truncf %130 : vector<16x64xf32> to vector<16x64xbf16>
    %c0_37 = arith.constant 0 : index
    %c0_38 = arith.constant 0 : index
    %132 = vector.load %arg4[%c0_37, %c0_38] : memref<64x32xbf16, #tpu.memory_space<vmem>>, vector<64x32xbf16>
    %cst_39 = arith.constant dense<0.000000e+00> : vector<16x32xf32>
    %133 = tpu.matmul %131, %132, %cst_39 {dimension_numbers = #tpu.dot_dimension_numbers<[1], [0], [0], [1], [0, 0, 1, 1], [], []>} : vector<16x64xbf16>, vector<64x32xbf16>, vector<16x32xf32> -> vector<16x32xf32>
    %134 = vector.broadcast %8 : vector<1x32xf32> to vector<16x32xf32>
    %135 = arith.addf %133, %134 : vector<16x32xf32>
    %136 = arith.addf %101, %135 : vector<16x32xf32>
    %c0_40 = arith.constant 0 : index
    %c0_41 = arith.constant 0 : index
    %137 = vector.load %arg5[%c0_40, %c0_41] : memref<16x32xf32, #tpu.memory_space<vmem>>, vector<16x32xf32>
    tpu.vector_store %arg5[%c0_40, %c0_41], %136 {strides = array<i32>} : memref<16x32xf32, #tpu.memory_space<vmem>>, vector<16x32xf32>,
    return
  }
}

</mosaic_0001>

<bundles_post_ra>
// kernel: tpu_custom_call.1
= control target key start
LH: loop header
LB: loop body
LE: loop exit
PB: predicated region body
PF: predicated region fallthrough
CT: control target
= control target key end

     0   :  { %10 = vsyncpa [#allocation3], 0  ;;  %s1452_s0 = inlined_call_operand.vmem [shape: f32[16,32], index: 0, kind: input, shape index: {}]   ;;  %s1453_s1 = inlined_call_operand.vmem [shape: f32[2,8], index: 1, kind: input, shape index: {}]   ;;  %s1454_s2 = inlined_call_operand.hbm [shape: f32[8,96], index: 2, kind: input, shape index: {}]   ;;  %s1455_s3 = inlined_call_operand.vmem [shape: bf16[32,192], index: 3, kind: input, shape index: {}]   ;;  %s1456_s4 = inlined_call_operand.vmem [shape: bf16[64,32], index: 4, kind: input, shape index: {}]   ;;  %s1457_s5 = inlined_call_operand.hbm [shape: f32[16,32], index: 5, kind: output, shape index: {}]  }
   0x1   :  { %11 = vsyncpa [#allocation4], 0  ;;  %s21_s20 = sshll.u32 %s1454_s2, 4  ;;  %s1172_s21 = smov [#allocation2]   ;;  %s22_s20 = int_to_ptr.hbm [resolvable:$true] %s21_s20 }
   0x2   :  { %s23_s22 = sshll.u32 %s1172_s21, 4  ;;  %s24_s22 = int_to_ptr.vmem [resolvable:$true] %s23_s22 }
   0x3   :  { %26 = dma.hbm_to_vmem [thread:$0]  %s22_s20, 128, %s24_s22, [#allocation3]  }
   0x4   :  { %1168 = dma.done.wait [#allocation3], 128  }
   0x5   :  { %1169 = vsyncadd [#allocation3], 4294967168  ;;  %vm46_vm0 = vcmask 261120   ;;  %v1222_v0 = vld [vmem:[%s1452_s0] sm:$0xff]  ;;  %v1229_v2 = vld [vmem:[%s1452_s0 + $0x8] sm:$0xff]  ;;  %v1173_v4 = vmov 32.0  }
   0x6   :  { %v47_v1 = vsel %vm46_vm0, %v1222_v0, 0.0  ;;  %v50_v3 = vsel %vm46_vm0, %v1229_v2, 0.0  ;;  %1070 = vrcp.f32 %v1173_v4  ;;  %v969_v21 = vld [vmem:[%s1455_s3 + $0x10] sm:$0xf]  ;;  %v1024_v22 = vld [vmem:[%s1455_s3 + $0x14] sm:$0xf0] }
   0x7   :  { %48 = vadd.xlane.f32.xlu0 %v47_v1  ;;  %v965_v23 = vld [vmem:[%s1455_s3] sm:$0xf]  ;;  %v970_v24 = vor.u32 %v1024_v22, %v969_v21  ;;  %v1023_v25 = vld [vmem:[%s1455_s3 + $0x4] sm:$0xf0]  ;;  %s1174_s8 = smov 104   ;;  %s1175_s9 = smov 120  }
   0x8   :  { %v966_v28 = vor.u32 %v1023_v25, %v965_v23  ;;  %v1062_v62 = vld [vmem:[#allocation2] ss:$0 sm:$0xff]  ;;  %v1064_v23 = vld [vmem:[#allocation2 + $0x2] ss:$0 sm:$0xff]  ;;  %s1176_s10 = smov 112   ;;  %s1177_s11 = smov 96  }
   0x9   :  { %163 = vmatpush.bf16.msra.mxu0 %v970_v24  ;;  %vm243_vm14 = vcmask 64512   ;;  %s1178_s12 = smov 64   ;;  %vm532_vm15 = vcmask 1043456   ;;  %s1180_s18 = smov 32  }
   0xa   :  { %s1181_s19 = smov 8   ;;  %s1182_s24 = smov 24  }
   0xb   :  { %s1183_s25 = smov 16   ;;  %s1184_s14 = smov [#allocation5]  }
   0xc   :  { %v1071_v5 = vpop.eup %1070  ;;  %s950_s16 = sshll.u32 %s1457_s5, 4  ;;  %s1185_s17 = smov 128   ;;  %s951_s16 = int_to_ptr.hbm [resolvable:$true] %s950_s16 }
   0xd   :  { %v54_v6 = vmul.f32 32.0, %v1071_v5  ;;  %vm58_vm1 = vweird.f32 %v1071_v5  ;;  %164 = vmatpush.bf16.msra.mxu0 %v966_v28 }
   0xf   :  { %51 = vadd.xlane.f32.xlu0 %v50_v3  ;;  %v55_v7 = vsub.f32 1.0, %v54_v6 }
  0x11   :  { %v56_v8 = vmul.f32 %v1071_v5, %v55_v7 }
  0x13   :  { %v57_v9 = vadd.f32 %v1071_v5, %v56_v8 }
  0x15   :  { %v1233_v10 = vsel %vm58_vm1, %v1071_v5, %v57_v9 }
  0x7a   :  { %v49_v11 = vpop.xlane.xlu0 %48 }
  0x7b   :  { %v60_v12 = vmul.f32 %v1233_v10, %v49_v11 }
  0x7d   :  { %v1237_v13 = vsub.f32 %v1222_v0, %v60_v12 }
  0x7f   :  { %v64_v14 = vmul.f32 %v1237_v13, %v1237_v13  ;;  %v99_v8 = vmul.f32 %v1062_v62, %v1237_v13 }
  0x81   :  { %v66_v15 = vsel %vm46_vm0, %v64_v14, 0.0 }
  0x82   :  { %67 = vadd.xlane.f32.xlu1 %v66_v15  ;;  %v52_v16 = vpop.xlane.xlu0 %51 }
  0x83   :  { %v61_v17 = vmul.f32 %v1233_v10, %v52_v16  ;;  %v1063_v16 = vld [vmem:[#allocation2 + $0x1] ss:$0 sm:$0xff] }
  0x85   :  { %v1244_v18 = vsub.f32 %v1229_v2, %v61_v17 }
  0x87   :  { %v65_v19 = vmul.f32 %v1244_v18, %v1244_v18  ;;  %v100_v12 = vmul.f32 %v1062_v62, %v1244_v18 }
  0x89   :  { %v69_v20 = vsel %vm46_vm0, %v65_v19, 0.0 }
  0x8a   :  { %70 = vadd.xlane.f32.xlu1 %v69_v20 }
  0xf5   :  { %v68_v26 = vpop.xlane.xlu1 %67 }
  0xf6   :  { %v72_v27 = vmul.f32 0.032258064, %v68_v26 }
  0xf8   :  { %1072 = vrsqrt.f32 %v72_v27  ;;  %vm81_vm2 = vcmp.eq.f32.partialorder %v72_v27, inf  ;;  %v84_v41 = vand.u32 2147483648, %v72_v27  ;;  %vm83_vm3 = vcmp.eq.f32.partialorder %v72_v27, 0.0 }
  0xfd   :  { %v71_v29 = vpop.xlane.xlu1 %70 }
  0xfe   :  { %v1073_v30 = vpop.eup %1072  ;;  %v73_v31 = vmul.f32 0.032258064, %v71_v29 }
  0xff   :  { %v75_v32 = vmul.f32 %v1073_v30, %v72_v27 }
 0x100   :  { %1074 = vrsqrt.f32 %v73_v31  ;;  %vm93_vm4 = vcmp.eq.f32.partialorder %v73_v31, inf  ;;  %v96_v49 = vand.u32 2147483648, %v73_v31  ;;  %vm95_vm5 = vcmp.eq.f32.partialorder %v73_v31, 0.0 }
 0x101   :  { %v76_v33 = vmul.f32 %v1073_v30, %v75_v32 }
 0x103   :  { %v77_v34 = vmul.f32 0.5, %v76_v33 }
 0x105   :  { %v78_v35 = vsub.f32 1.5, %v77_v34 }
 0x106   :  { %v1075_v36 = vpop.eup %1074 }
 0x107   :  { %v79_v37 = vmul.f32 %v1073_v30, %v78_v35  ;;  %v87_v38 = vmul.f32 %v1075_v36, %v73_v31 }
 0x109   :  { %v80_v39 = vmul.f32 %v79_v37, %v72_v27  ;;  %v88_v40 = vmul.f32 %v1075_v36, %v87_v38 }
 0x10b   :  { %v82_v42 = vsel %vm81_vm2, %v72_v27, %v80_v39  ;;  %v89_v43 = vmul.f32 0.5, %v88_v40  ;;  %vm722_vm2 = vcmask 130048  }
 0x10c   :  { %v85_v44 = vsel %vm83_vm3, %v84_v41, %v82_v42  ;;  %vm725_vm3 = vcmask 195584  }
 0x10d   :  { %v90_v45 = vsub.f32 1.5, %v89_v43  ;;  %v101_v46 = vadd.f32 1e-06, %v85_v44 }
 0x10f   :  { %v91_v47 = vmul.f32 %v1075_v36, %v90_v45  ;;  %1076 = vrcp.f32 %v101_v46  ;;  %v114_v59 = vand.u32 2147483648, %v101_v46  ;;  %vm108_vm7 = vweird.f32 %v101_v46 }
 0x110   :  { %v112_v60 = vand.u32 2147483647, %v101_v46 }
 0x111   :  { %v92_v48 = vmul.f32 %v91_v47, %v73_v31  ;;  %v115_v3 = vor.u32 1.1754944e-38, %v114_v59 }
 0x112   :  { %vm113_vm9 = vcmp.eq.f32.partialorder %v112_v60, 8.507059e+37 }
 0x113   :  { %v94_v50 = vsel %vm93_vm4, %v73_v31, %v92_v48 }
 0x114   :  { %v97_v51 = vsel %vm95_vm5, %v96_v49, %v94_v50 }
 0x115   :  { %v1077_v52 = vpop.eup %1076  ;;  %v102_v53 = vadd.f32 1e-06, %v97_v51 }
 0x116   :  { %v104_v54 = vmul.f32 %v1077_v52, %v101_v46  ;;  %vm109_vm6 = vweird.f32 %v1077_v52 }
 0x117   :  { %1078 = vrcp.f32 %v102_v53  ;;  %vm110_vm8 = vmor %vm108_vm7, %vm109_vm6  ;;  %v129_v4 = vand.u32 2147483648, %v102_v53  ;;  %v127_v6 = vand.u32 2147483647, %v102_v53  ;;  %vm123_vm11 = vweird.f32 %v102_v53 }
 0x118   :  { %v105_v55 = vsub.f32 1.0, %v104_v54 }
 0x119   :  { %v130_v11 = vor.u32 1.1754944e-38, %v129_v4  ;;  %vm128_vm13 = vcmp.eq.f32.partialorder %v127_v6, 8.507059e+37 }
 0x11a   :  { %v106_v56 = vmul.f32 %v1077_v52, %v105_v55 }
 0x11c   :  { %v107_v57 = vadd.f32 %v1077_v52, %v106_v56 }
 0x11d   :  { %v1079_v58 = vpop.eup %1078 }
 0x11e   :  { %v119_v61 = vmul.f32 %v1079_v58, %v102_v53  ;;  %v111_v63 = vsel %vm110_vm8, %v1077_v52, %v107_v57  ;;  %vm124_vm10 = vweird.f32 %v1079_v58 }
 0x11f   :  { %v116_v7 = vsel %vm113_vm9, %v115_v3, %v111_v63  ;;  %vm125_vm12 = vmor %vm123_vm11, %vm124_vm10 }
 0x120   :  { %v120_v1 = vsub.f32 1.0, %v119_v61  ;;  %v117_v14 = vmul.f32 %v116_v7, %v99_v8 }
 0x122   :  { %v121_v5 = vmul.f32 %v1079_v58, %v120_v1  ;;  %v134_v20 = vadd.f32 %v1063_v16, %v117_v14 }
 0x124   :  { %v122_v9 = vadd.f32 %v1079_v58, %v121_v5 }
 0x126   :  { %v126_v15 = vsel %vm125_vm12, %v1079_v58, %v122_v9 }
 0x127   :  { %v131_v17 = vsel %vm128_vm13, %v130_v11, %v126_v15 }
 0x128   :  { %v132_v19 = vmul.f32 %v131_v17, %v100_v12 }
 0x12a   :  { %v135_v21 = vadd.f32 %v1063_v16, %v132_v19 }
 0x12c   :  { %v136_v22 = vpack.c.bf16 %v135_v21, %v134_v20 }
 0x12e   :  { %971 = vmatmul.msk.bf16.vlgmr.msra.gmra.mxu0 %vm46_vm0, %v136_v22 }
 0x1ab   :  { %v166_v24 = vpop.f32.mrf.mxu0 }
 0x1ac   :  { %v167_v13 = vadd.f32 %v1064_v23, %v166_v24 }
 0x1ae   :  { %215 = vrot.lane.b32.xlu1 %v167_v13, %s1174_s8  ;;  %203 = vrot.lane.b32.xlu2 %v167_v13, %s1175_s9  ;;  %v221_v18 = vpack.c.bf16 %v167_v13, %v167_v13  ;;  %v171_v32 = vmul.f32 0.35355338, %v167_v13 }
 0x1b0   :  { %v239_v25 = vunpack.c.l.b16 %v221_v18  ;;  %v193_v60 = vpack.c.bf16 %v171_v32, %v171_v32 }
 0x1b2   :  { %v240_v28 = vpack.c.b16 %v239_v25, %v239_v25 }
 0x1b3   :  { %v168_v26 = vpop.f32.mrf.mxu0 }
 0x1b4   :  { %v169_v27 = vadd.f32 %v1064_v23, %v168_v26 }
 0x1b6   :  { %211 = vrot.lane.b32.xlu0 %v169_v27, %s1176_s10  ;;  %205 = vrot.lane.b32.xlu2 %v169_v27, %s1175_s9  ;;  %v222_v29 = vpack.c.bf16 %v169_v27, %v169_v27  ;;  %v172_v43 = vmul.f32 0.35355338, %v169_v27 }
 0x1b7   :  { %241 = vrot.lane.b32.xlu1 %v240_v28, %s1177_s11 }
 0x1b8   :  { %v264_v30 = vunpack.c.l.b16 %v222_v29  ;;  %v194_v59 = vpack.c.bf16 %v172_v43, %v172_v43 }
 0x1ba   :  { %v265_v31 = vpack.c.b16 %v264_v30, %v264_v30  ;;  %v1179_v30 = vmov -1e+09  }
 0x1be   :  { %209 = vrot.lane.b32.xlu2 %v167_v13, %s1176_s10 }
 0x1c6   :  { %217 = vrot.lane.b32.xlu2 %v169_v27, %s1174_s8  ;;  %v229_v27 = vld [vmem:[%s1453_s1] sm:$0x3] }
 0x1c7   :  { %vm230_vm1 = vcmp.gt.f32.partialorder %v229_v27, 0.0 }
 0x1ce   :  { %266 = vrot.lane.b32.xlu2 %v265_v31, %s1177_s11 }
 0x1d6   :  { %175 = vrot.lane.b32.xlu2 %v171_v32, %s1175_s9 }
 0x208   :  { %v204_v33 = vpop.permute.xlu2 %203 }
 0x209   :  { %v223_v34 = vpack.c.bf16 %v204_v33, %v204_v33 }
 0x20b   :  { %v288_v35 = vunpack.c.l.b16 %v223_v34 }
 0x20d   :  { %v289_v36 = vpack.c.b16 %v288_v35, %v288_v35 }
 0x20f   :  { %290 = vrot.lane.b32.xlu0 %v289_v36, %s1177_s11 }
 0x210   :  { %v206_v37 = vpop.permute.xlu2 %205 }
 0x211   :  { %v224_v38 = vpack.c.bf16 %v206_v37, %v206_v37 }
 0x213   :  { %v312_v39 = vunpack.c.l.b16 %v224_v38 }
 0x215   :  { %v1274_v40 = vpack.c.b16 %v312_v39, %v312_v39 }
 0x217   :  { %314 = vrot.lane.b32.xlu0 %v1274_v40, %s1177_s11 }
 0x218   :  { %v210_v41 = vpop.permute.xlu2 %209 }
 0x219   :  { %v225_v42 = vpack.c.bf16 %v210_v41, %v210_v41 }
 0x21b   :  { %v336_v46 = vunpack.c.l.b16 %v225_v42 }
 0x21d   :  { %v1279_v49 = vpack.c.b16 %v336_v46, %v336_v46 }
 0x21f   :  { %177 = vrot.lane.b32.xlu0 %v172_v43, %s1175_s9 }
 0x220   :  { %v216_v44 = vpop.permute.xlu1 %215  ;;  %v218_v45 = vpop.permute.xlu2 %217 }
 0x221   :  { %v227_v47 = vpack.c.bf16 %v216_v44, %v216_v44  ;;  %v228_v61 = vpack.c.bf16 %v218_v45, %v218_v45 }
 0x223   :  { %v384_v48 = vunpack.c.l.b16 %v227_v47  ;;  %v408_v62 = vunpack.c.l.b16 %v228_v61 }
 0x225   :  { %v1281_v50 = vpack.c.b16 %v384_v48, %v384_v48  ;;  %v1300_v63 = vpack.c.b16 %v408_v62, %v408_v62 }
 0x227   :  { %338 = vrot.lane.b32.xlu0 %v1279_v49, %s1177_s11  ;;  %386 = vrot.lane.b32.xlu1 %v1281_v50, %s1177_s11 }
 0x228   :  { %v212_v51 = vpop.permute.xlu0 %211  ;;  %v267_v52 = vpop.permute.xlu2 %266 }
 0x229   :  { %v226_v53 = vpack.c.bf16 %v212_v51, %v212_v51  ;;  %v242_v54 = vpop.permute.xlu1 %241  ;;  %v272_v55 = vsel %vm243_vm14, %v267_v52, 0 }
 0x22a   :  { %v248_v56 = vsel %vm243_vm14, %v242_v54, 0  ;;  %281 = vmatpush.bf16.xpose.msra.mxu2 %v272_v55 }
 0x22b   :  { %v360_v57 = vunpack.c.l.b16 %v226_v53  ;;  %257 = vmatpush.bf16.xpose.msra.mxu1 %v248_v56 }
 0x22d   :  { %v1289_v58 = vpack.c.b16 %v360_v57, %v360_v57 }
 0x22f   :  { %189 = vrot.lane.b32.xlu0 %v172_v43, %s1174_s8  ;;  %187 = vrot.lane.b32.xlu1 %v171_v32, %s1174_s8 }
 0x230   :  { %362 = vrot.lane.b32.xlu2 %v1289_v58, %s1177_s11  ;;  %v176_v3 = vpop.permute.xlu2 %175 }
 0x231   :  { %973 = vmatmul.msk.bf16.vlgmr.msra.gmra.mxu2 %vm243_vm14, %v194_v59  ;;  %v195_v5 = vpack.c.bf16 %v176_v3, %v176_v3 }
 0x232   :  { %972 = vmatmul.msk.bf16.vlgmr.msra.gmra.mxu1 %vm243_vm14, %v193_v60 }
 0x237   :  { %527 = vrot.lane.b32.xlu0 %v240_v28, %s1178_s12  ;;  %181 = vrot.lane.b32.xlu1 %v171_v32, %s1176_s10 }
 0x238   :  { %183 = vrot.lane.b32.xlu2 %v172_v43, %s1176_s10 }
 0x23f   :  { %570 = vrot.lane.b32.xlu1 %v289_v36, %s1178_s12 }
 0x240   :  { %410 = vrot.lane.b32.xlu2 %v1300_v63, %s1177_s11 }
 0x248   :  { %549 = vrot.lane.b32.xlu2 %v265_v31, %s1178_s12  ;;  %v231_v31 = vsel %vm230_vm1, 0.0, %v1179_v30  ;;  %vm922_vm1 = vcmask 523264  }
 0x249   :  { %v234_v34 = vperm.slane %v231_v31, 0  ;;  %v233_v35 = vrot.slane %v231_v31, 1 }
 0x24b   :  { %v235_v39 = vperm.slane %v233_v35, 0 }
 0x281   :  { %v291_v1 = vpop.permute.xlu0 %290 }
 0x282   :  { %v296_v4 = vsel %vm243_vm14, %v291_v1, 0 }
 0x283   :  { %305 = vmatpush.bf16.xpose.msra.mxu3 %v296_v4 }
 0x289   :  { %v315_v6 = vpop.permute.xlu0 %314 }
 0x28a   :  { %v363_v7 = vpop.permute.xlu2 %362  ;;  %974 = vmatmul.msk.bf16.vlgmr.msra.gmra.mxu3 %vm243_vm14, %v195_v5  ;;  %v320_v8 = vsel %vm243_vm14, %v315_v6, 0 }
 0x28b   :  { %329 = vmatpush.bf16.xpose.msrb.mxu0 %v320_v8  ;;  %v368_v9 = vsel %vm243_vm14, %v363_v7, 0 }
 0x28c   :  { %377 = vmatpush.bf16.xpose.msrb.mxu2 %v368_v9 }
 0x291   :  { %v178_v11 = vpop.permute.xlu0 %177 }
 0x292   :  { %v196_v12 = vpack.c.bf16 %v178_v11, %v178_v11  ;;  %v184_v14 = vpop.permute.xlu2 %183 }
 0x293   :  { %v198_v15 = vpack.c.bf16 %v184_v14, %v184_v14 }
 0x294   :  { %975 = vmatmul.msk.bf16.vlgmr.msrb.gmra.mxu0 %vm243_vm14, %v196_v12 }
 0x295   :  { %977 = vmatmul.msk.bf16.vlgmr.msrb.gmra.mxu2 %vm243_vm14, %v198_v15 }
 0x299   :  { %v339_v16 = vpop.permute.xlu0 %338  ;;  %v387_v17 = vpop.permute.xlu1 %386 }
 0x29a   :  { %v411_v19 = vpop.permute.xlu2 %410  ;;  %v344_v20 = vsel %vm243_vm14, %v339_v16, 0  ;;  %v392_v21 = vsel %vm243_vm14, %v387_v17, 0 }
 0x29b   :  { %v416_v22 = vsel %vm243_vm14, %v411_v19, 0  ;;  %353 = vmatpush.bf16.xpose.msrb.mxu1 %v344_v20  ;;  %401 = vmatpush.bf16.xpose.msrb.mxu3 %v392_v21 }
 0x29c   :  { %425 = vmatpush.bf16.xpose.msra.mxu0 %v416_v22 }
 0x2a1   :  { %v190_v23 = vpop.permute.xlu0 %189  ;;  %v188_v24 = vpop.permute.xlu1 %187 }
 0x2a2   :  { %v200_v13 = vpack.c.bf16 %v190_v23, %v190_v23  ;;  %v199_v18 = vpack.c.bf16 %v188_v24, %v188_v24  ;;  %v550_v25 = vpop.permute.xlu2 %549 }
 0x2a3   :  { %v555_v26 = vsel %vm532_vm15, %v550_v25, 0 }
 0x2a4   :  { %564 = vmatpush.bf16.msra.mxu2 %v555_v26  ;;  %978 = vmatmul.msk.bf16.vlgmr.msrb.gmra.mxu3 %vm243_vm14, %v199_v18 }
 0x2a5   :  { %979 = vmatmul.msk.bf16.vlgmr.msra.gmra.mxu0 %vm243_vm14, %v200_v13 }
 0x2a9   :  { %v528_v28 = vpop.permute.xlu0 %527  ;;  %v182_v29 = vpop.permute.xlu1 %181 }
 0x2aa   :  { %v534_v32 = vsel %vm532_vm15, %v528_v28, 0  ;;  %v197_v33 = vpack.c.bf16 %v182_v29, %v182_v29 }
 0x2ab   :  { %543 = vmatpush.bf16.msra.mxu1 %v534_v32 }
 0x2ac   :  { %976 = vmatmul.msk.bf16.vlgmr.msrb.gmra.mxu1 %vm243_vm14, %v197_v33 }
 0x2af   :  { %v259_v36 = vpop.f32.mrf.mxu1 }
 0x2b0   :  { %v260_v37 = vadd.f32 %v259_v36, %v234_v34 }
 0x2b1   :  { %v571_v38 = vpop.permute.xlu1 %570 }
 0x2b2   :  { %v576_v41 = vsel %vm532_vm15, %v571_v38, 0  ;;  %v431_v42 = vsel %vm243_vm14, %v260_v37, -inf }
 0x2b3   :  { %432 = vmax.xlane.f32.xlu0 %v431_v42  ;;  %585 = vmatpush.bf16.msra.mxu3 %v576_v41 }
 0x2b4   :  { %v283_v43 = vpop.f32.mrf.mxu2 }
 0x2b5   :  { %v284_v44 = vadd.f32 %v283_v43, %v235_v39 }
 0x2b7   :  { %v261_v45 = vpop.f32.mrf.mxu1  ;;  %v434_v46 = vsel %vm243_vm14, %v284_v44, -inf }
 0x2b8   :  { %435 = vmax.xlane.f32.xlu2 %v434_v46 }
 0x2bc   :  { %v285_v47 = vpop.f32.mrf.mxu2 }
 0x30d   :  { %v307_v48 = vpop.f32.mrf.mxu3 }
 0x30e   :  { %v308_v51 = vadd.f32 %v307_v48, %v234_v34 }
 0x310   :  { %v437_v52 = vsel %vm243_vm14, %v308_v51, -inf }
 0x311   :  { %v331_v53 = vpop.f32.mrf.mxu0  ;;  %438 = vmax.xlane.f32.xlu1 %v437_v52 }
 0x312   :  { %v332_v15 = vadd.f32 %v331_v53, %v235_v39 }
 0x314   :  { %v440_v20 = vsel %vm243_vm14, %v332_v15, -inf }
 0x315   :  { %v309_v54 = vpop.f32.mrf.mxu3 }
 0x318   :  { %v379_v55 = vpop.f32.mrf.mxu2 }
 0x319   :  { %v333_v56 = vpop.f32.mrf.mxu0  ;;  %v380_v22 = vadd.f32 %v379_v55, %v235_v39 }
 0x31b   :  { %v446_v24 = vsel %vm243_vm14, %v380_v22, -inf }
 0x320   :  { %v381_v57 = vpop.f32.mrf.mxu2 }
 0x322   :  { %v427_v59 = vpop.f32.mrf.mxu0 }
 0x323   :  { %v428_v13 = vadd.f32 %v427_v59, %v235_v39 }
 0x325   :  { %v452_v18 = vsel %vm243_vm14, %v428_v13, -inf }
 0x326   :  { %v433_v60 = vpop.xlane.xlu0 %432 }
 0x327   :  { %v455_v61 = vsub.f32 %v260_v37, %v433_v60  ;;  %v403_v62 = vpop.f32.mrf.mxu3 }
 0x328   :  { %v404_v1 = vadd.f32 %v403_v62, %v234_v34 }
 0x329   :  { %v463_v3 = vmul.f32 1.442695, %v455_v61  ;;  %v355_v4 = vpop.f32.mrf.mxu1 }
 0x32a   :  { %v356_v5 = vadd.f32 %v355_v4, %v234_v34  ;;  %v429_v6 = vpop.f32.mrf.mxu0  ;;  %v449_v7 = vsel %vm243_vm14, %v404_v1, -inf }
 0x32b   :  { %1080 = vpow2.f32 %v463_v3  ;;  %v436_v8 = vpop.xlane.xlu2 %435  ;;  %450 = vmax.xlane.f32.xlu0 %v449_v7 }
 0x32c   :  { %v456_v9 = vsub.f32 %v284_v44, %v436_v8  ;;  %v443_v11 = vsel %vm243_vm14, %v356_v5, -inf }
 0x32d   :  { %444 = vmax.xlane.f32.xlu2 %v443_v11 }
 0x32e   :  { %v465_v12 = vmul.f32 1.442695, %v456_v9 }
 0x32f   :  { %v405_v14 = vpop.f32.mrf.mxu3 }
 0x330   :  { %1082 = vpow2.f32 %v465_v12 }
 0x331   :  { %v1081_v16 = vpop.eup %1080  ;;  %v357_v17 = vpop.f32.mrf.mxu1 }
 0x332   :  { %v479_v19 = vsel %vm243_vm14, %v1081_v16, 0.0 }
 0x333   :  { %480 = vadd.xlane.f32.xlu1 %v479_v19 }
 0x335   :  { %441 = vmax.xlane.f32.xlu2 %v440_v20 }
 0x336   :  { %v1083_v21 = vpop.eup %1082 }
 0x337   :  { %v482_v23 = vsel %vm243_vm14, %v1083_v21, 0.0 }
 0x338   :  { %483 = vadd.xlane.f32.xlu0 %v482_v23 }
 0x33b   :  { %447 = vmax.xlane.f32.xlu1 %v446_v24 }
 0x343   :  { %453 = vmax.xlane.f32.xlu1 %v452_v18 }
 0x34d   :  { %591 = vrot.lane.b32.xlu2 %v1274_v40, %s1178_s12 }
 0x35c   :  { %633 = vrot.lane.b32.xlu1 %v1289_v58, %s1178_s12 }
 0x384   :  { %v439_v25 = vpop.xlane.xlu1 %438 }
 0x385   :  { %v457_v31 = vsub.f32 %v308_v51, %v439_v25 }
 0x387   :  { %v467_v34 = vmul.f32 1.442695, %v457_v31 }
 0x39e   :  { %v451_v26 = vpop.xlane.xlu0 %450 }
 0x39f   :  { %v461_v27 = vsub.f32 %v404_v1, %v451_v26 }
 0x3a0   :  { %v445_v28 = vpop.xlane.xlu2 %444 }
 0x3a1   :  { %v475_v29 = vmul.f32 1.442695, %v461_v27  ;;  %v459_v30 = vsub.f32 %v356_v5, %v445_v28 }
 0x3a3   :  { %1084 = vpow2.f32 %v475_v29  ;;  %v471_v32 = vmul.f32 1.442695, %v459_v30 }
 0x3a5   :  { %1086 = vpow2.f32 %v471_v32 }
 0x3a6   :  { %v481_v33 = vpop.xlane.xlu1 %480 }
 0x3a7   :  { %1088 = vrcp.f32 %v481_v33 }
 0x3a8   :  { %v442_v35 = vpop.xlane.xlu2 %441  ;;  %1090 = vpow2.f32 %v467_v34 }
 0x3a9   :  { %v1338_v36 = vpop.eup %1084  ;;  %v458_v40 = vsub.f32 %v332_v15, %v442_v35 }
 0x3aa   :  { %v497_v58 = vsel %vm243_vm14, %v1338_v36, 0.0 }
 0x3ab   :  { %v1342_v37 = vpop.eup %1086  ;;  %v469_v38 = vmul.f32 1.442695, %v458_v40  ;;  %498 = vadd.xlane.f32.xlu1 %v497_v58  ;;  %v484_v39 = vpop.xlane.xlu0 %483 }
 0x3ac   :  { %1092 = vrcp.f32 %v484_v39  ;;  %v491_v41 = vsel %vm243_vm14, %v1342_v37, 0.0 }
 0x3ad   :  { %v1089_v42 = vpop.eup %1088  ;;  %1094 = vpow2.f32 %v469_v38  ;;  %492 = vadd.xlane.f32.xlu2 %v491_v41  ;;  %v1026_v41 = vld [vmem:[%s1455_s3 + $0x14] sm:$0xf0] }
 0x3ae   :  { %v511_v43 = vmul.f32 %v1089_v42, %v1081_v16  ;;  %v448_v44 = vpop.xlane.xlu1 %447  ;;  %v1091_v48 = vpop.eup %1090 }
 0x3af   :  { %v460_v45 = vsub.f32 %v380_v22, %v448_v44  ;;  %v485_v56 = vsel %vm243_vm14, %v1091_v48, 0.0 }
 0x3b0   :  { %v519_v46 = vpack.c.bf16 %v511_v43, %v511_v43  ;;  %v592_v47 = vpop.permute.xlu2 %591 }
 0x3b1   :  { %v473_v51 = vmul.f32 1.442695, %v460_v45  ;;  %v597_v52 = vsel %vm532_vm15, %v592_v47, 0  ;;  %v1025_v47 = vld [vmem:[%s1455_s3 + $0x4] sm:$0xf0] }
 0x3b2   :  { %v1093_v53 = vpop.eup %1092  ;;  %980 = vmatmul.msk.bf16.vlgmr.msra.gmra.mxu1 %vm243_vm14, %v519_v46  ;;  %606 = vmatpush.bf16.msrb.mxu0 %v597_v52  ;;  %v990_v46 = vld [vmem:[%s1455_s3] sm:$0xf] }
 0x3b3   :  { %v1095_v54 = vpop.eup %1094  ;;  %v512_v55 = vmul.f32 %v1093_v53, %v1083_v21  ;;  %1096 = vpow2.f32 %v473_v51 }
 0x3b4   :  { %v488_v57 = vsel %vm243_vm14, %v1095_v54, 0.0 }
 0x3b5   :  { %v520_v59 = vpack.c.bf16 %v512_v55, %v512_v55  ;;  %486 = vadd.xlane.f32.xlu2 %v485_v56  ;;  %489 = vadd.xlane.f32.xlu0 %v488_v57 }
 0x3b6   :  { %v454_v60 = vpop.xlane.xlu1 %453 }
 0x3b7   :  { %v462_v61 = vsub.f32 %v428_v13, %v454_v60  ;;  %981 = vmatmul.msk.bf16.vlgmr.msra.gmra.mxu2 %vm243_vm14, %v520_v59 }
 0x3b9   :  { %v1097_v62 = vpop.eup %1096  ;;  %v477_v1 = vmul.f32 1.442695, %v462_v61 }
 0x3ba   :  { %v494_v3 = vsel %vm243_vm14, %v1097_v62, 0.0 }
 0x3bb   :  { %1098 = vpow2.f32 %v477_v1 }
 0x3bd   :  { %495 = vadd.xlane.f32.xlu0 %v494_v3 }
 0x3c1   :  { %v1099_v4 = vpop.eup %1098 }
 0x3c2   :  { %v500_v5 = vsel %vm243_vm14, %v1099_v4, 0.0 }
 0x3c4   :  { %675 = vrot.lane.b32.xlu1 %v1300_v63, %s1178_s12 }
 0x3c5   :  { %501 = vadd.xlane.f32.xlu0 %v500_v5 }
 0x3cd   :  { %654 = vrot.lane.b32.xlu2 %v1281_v50, %s1178_s12 }
 0x3ce   :  { %v634_v6 = vpop.permute.xlu1 %633 }
 0x3cf   :  { %v639_v7 = vsel %vm532_vm15, %v634_v6, 0 }
 0x3d0   :  { %648 = vmatpush.bf16.msrb.mxu2 %v639_v7 }
 0x3d9   :  { %612 = vrot.lane.b32.xlu0 %v1279_v49, %s1178_s12 }
 0x41e   :  { %v499_v12 = vpop.xlane.xlu1 %498 }
 0x420   :  { %v493_v8 = vpop.xlane.xlu2 %492 }
 0x428   :  { %v487_v9 = vpop.xlane.xlu2 %486  ;;  %v490_v11 = vpop.xlane.xlu0 %489 }
 0x429   :  { %1100 = vrcp.f32 %v487_v9 }
 0x42a   :  { %1102 = vrcp.f32 %v490_v11 }
 0x42f   :  { %v1101_v63 = vpop.eup %1100  ;;  %v1360_v14 = vpop.f32.mrf.mxu1 }
 0x430   :  { %v1103_v15 = vpop.eup %1102  ;;  %v513_v16 = vmul.f32 %v1101_v63, %v1091_v48  ;;  %v655_v17 = vpop.permute.xlu2 %654  ;;  %v991_v48 = vor.u32 %v1025_v47, %v990_v46 }
 0x431   :  { %v496_v50 = vpop.xlane.xlu0 %495  ;;  %v514_v19 = vmul.f32 %v1103_v15, %v1095_v54  ;;  %v660_v20 = vsel %vm532_vm15, %v655_v17, 0 }
 0x432   :  { %1104 = vrcp.f32 %v496_v50  ;;  %v521_v21 = vpack.c.bf16 %v513_v16, %v513_v16  ;;  %669 = vmatpush.bf16.msrb.mxu3 %v660_v20 }
 0x433   :  { %v522_v49 = vpack.c.bf16 %v514_v19, %v514_v19  ;;  %1106 = vrcp.f32 %v499_v12 }
 0x434   :  { %982 = vmatmul.msk.bf16.vlgmr.msra.gmra.mxu3 %vm243_vm14, %v521_v21 }
 0x435   :  { %983 = vmatmul.msk.bf16.vlgmr.msrb.gmra.mxu0 %vm243_vm14, %v522_v49  ;;  %v1065_v49 = vld [vmem:[#allocation2 + $0x3] ss:$0 sm:$0xff] }
 0x436   :  { %v676_v22 = vpop.permute.xlu1 %675 }
 0x437   :  { %v547_v24 = vpop.f32.mrf.mxu1  ;;  %v681_v13 = vsel %vm532_vm15, %v676_v22, 0 }
 0x438   :  { %v1105_v23 = vpop.eup %1104  ;;  %690 = vmatpush.bf16.msra.mxu0 %v681_v13 }
 0x439   :  { %v516_v18 = vmul.f32 %v1105_v23, %v1097_v62  ;;  %v502_v25 = vpop.xlane.xlu0 %501  ;;  %v1107_v28 = vpop.eup %1106 }
 0x43a   :  { %1108 = vrcp.f32 %v502_v25  ;;  %v1366_v27 = vpop.f32.mrf.mxu2  ;;  %v517_v29 = vmul.f32 %v1107_v28, %v1338_v36  ;;  %v994_v36 = vld [vmem:[%s1455_s3 + $0x10] sm:$0xf] }
 0x43b   :  { %v524_v26 = vpack.c.bf16 %v516_v18, %v516_v18  ;;  %1110 = vrcp.f32 %v493_v8  ;;  %v995_v42 = vor.u32 %v1026_v41, %v994_v36 }
 0x43c   :  { %v525_v32 = vpack.c.bf16 %v517_v29, %v517_v29 }
 0x43d   :  { %985 = vmatmul.msk.bf16.vlgmr.msrb.gmra.mxu2 %vm243_vm14, %v524_v26  ;;  %746 = vrot.lane.b32.xlu0 %v995_v42, %s1180_s18 }
 0x440   :  { %v1109_v30 = vpop.eup %1108 }
 0x441   :  { %v518_v31 = vmul.f32 %v1109_v30, %v1099_v4  ;;  %v1111_v35 = vpop.eup %1110 }
 0x442   :  { %v568_v34 = vpop.f32.mrf.mxu2  ;;  %v515_v40 = vmul.f32 %v1111_v35, %v1342_v37 }
 0x443   :  { %v526_v33 = vpack.c.bf16 %v518_v31, %v518_v31 }
 0x444   :  { %986 = vmatmul.msk.bf16.vlgmr.msrb.gmra.mxu3 %vm243_vm14, %v525_v32  ;;  %v523_v39 = vpack.c.bf16 %v515_v40, %v515_v40 }
 0x445   :  { %987 = vmatmul.msk.bf16.vlgmr.msra.gmra.mxu0 %vm243_vm14, %v526_v33 }
 0x44b   :  { %v613_v58 = vpop.permute.xlu0 %612 }
 0x44c   :  { %v618_v38 = vsel %vm532_vm15, %v613_v58, 0  ;;  %v1003_v58 = vld [vmem:[%s1455_s3 + $0x14] sm:$0xf] }
 0x44d   :  { %627 = vmatpush.bf16.msrb.mxu1 %v618_v38  ;;  %v1028_v38 = vld [vmem:[%s1455_s3 + $0x18] sm:$0xf0] }
 0x44e   :  { %v1004_v36 = vor.u32 %v1028_v38, %v1003_v58  ;;  %v1029_v58 = vld [vmem:[%s1456_s4] sm:$0xff] }
 0x450   :  { %984 = vmatmul.msk.bf16.vlgmr.msrb.gmra.mxu1 %vm243_vm14, %v523_v39  ;;  %v1027_v39 = vld [vmem:[%s1455_s3 + $0x8] sm:$0xf0]  ;;  %878 = vmatpush.bf16.msra.mxu2 %v1004_v36 }
 0x4af   :  { %v747_v1 = vpop.permute.xlu0 %746 }
 0x4b0   :  { %759 = vmatpush.bf16.msra.mxu1 %v747_v1 }
 0x4b2   :  { %v608_v43 = vpop.f32.mrf.mxu0 }
 0x4b7   :  { %v587_v37 = vpop.f32.mrf.mxu3 }
 0x4b8   :  { %v1047_v44 = vpack.i.bf16 %v608_v43, %v587_v37 }
 0x4ba   :  { %v610_v45 = vpop.f32.mrf.mxu0  ;;  %1048 = vrot.lane.b32.xlu2 %v1047_v44, %s1181_s19 }
 0x4bf   :  { %v589_v51 = vpop.f32.mrf.mxu3 }
 0x4c0   :  { %v650_v52 = vpop.f32.mrf.mxu2 }
 0x4c2   :  { %v692_v53 = vpop.f32.mrf.mxu0  ;;  %744 = vrot.lane.b32.xlu2 %v991_v48, %s1180_s18 }
 0x4c7   :  { %v671_v55 = vpop.f32.mrf.mxu3 }
 0x4c8   :  { %v652_v54 = vpop.f32.mrf.mxu2  ;;  %v1057_v56 = vpack.i.bf16 %v692_v53, %v671_v55 }
 0x4ca   :  { %v694_v57 = vpop.f32.mrf.mxu0  ;;  %1058 = vrot.lane.b32.xlu0 %v1057_v56, %s1182_s24 }
 0x4cd   :  { %v629_v59 = vpop.f32.mrf.mxu1 }
 0x4ce   :  { %v1052_v60 = vpack.i.bf16 %v650_v52, %v629_v59 }
 0x4cf   :  { %v673_v61 = vpop.f32.mrf.mxu3 }
 0x4d0   :  { %1053 = vrot.lane.b32.xlu1 %v1052_v60, %s1183_s25 }
 0x4d5   :  { %v631_v62 = vpop.f32.mrf.mxu1 }
 0x514   :  { %v1049_v3 = vpop.permute.xlu2 %1048 }
 0x515   :  { %v1051_v5 = vunpack.i.h.bf16 %v1049_v3  ;;  %v1050_v6 = vunpack.i.l.bf16 %v1049_v3 }
 0x517   :  { %v721_v12 = vsel %vm243_vm14, %v1366_v27, %v1051_v5  ;;  %v720_v63 = vsel %vm243_vm14, %v1360_v14, %v1050_v6 }
 0x51c   :  { %v745_v4 = vpop.permute.xlu2 %744 }
 0x51d   :  { %760 = vmatpush.bf16.msra.mxu1 %v745_v4 }
 0x53c   :  { %v1059_v7 = vpop.permute.xlu0 %1058 }
 0x53d   :  { %v1061_v15 = vunpack.i.h.bf16 %v1059_v7  ;;  %v1060_v16 = vunpack.i.l.bf16 %v1059_v7 }
 0x542   :  { %v1054_v8 = vpop.permute.xlu1 %1053 }
 0x543   :  { %v1056_v9 = vunpack.i.h.bf16 %v1054_v8  ;;  %v1055_v11 = vunpack.i.l.bf16 %v1054_v8 }
 0x545   :  { %v724_v17 = vsel %vm722_vm2, %v721_v12, %v1056_v9  ;;  %v723_v50 = vsel %vm722_vm2, %v720_v63, %v1055_v11 }
 0x546   :  { %v726_v19 = vsel %vm725_vm3, %v723_v50, %v1060_v16  ;;  %v727_v20 = vsel %vm725_vm3, %v724_v17, %v1061_v15  ;;  %v1066_v50 = vld [vmem:[#allocation2 + $0x4] ss:$0 sm:$0xff] }
 0x547   :  { %v728_v21 = vpack.c.bf16 %v727_v20, %v726_v19 }
 0x549   :  { %996 = vmatmul.msk.bf16.vlgmr.msra.gmra.mxu1 %vm46_vm0, %v728_v21 }
 0x5c6   :  { %v762_v22 = vpop.f32.mrf.mxu1 }
 0x5c7   :  { %v763_v23 = vadd.f32 %v1065_v49, %v762_v22 }
 0x5c9   :  { %v1394_v24 = vadd.f32 %v763_v23, %v1222_v0 }
 0x5cb   :  { %v769_v13 = vsel %vm46_vm0, %v1394_v24, 0.0 }
 0x5cc   :  { %770 = vadd.xlane.f32.xlu1 %v769_v13 }
 0x5ce   :  { %v764_v14 = vpop.f32.mrf.mxu1 }
 0x5cf   :  { %v765_v18 = vadd.f32 %v1065_v49, %v764_v14 }
 0x5d1   :  { %v1399_v25 = vadd.f32 %v765_v18, %v1229_v2 }
 0x5d3   :  { %v772_v26 = vsel %vm46_vm0, %v1399_v25, 0.0 }
 0x5d4   :  { %773 = vadd.xlane.f32.xlu0 %v772_v26 }
 0x63f   :  { %v771_v27 = vpop.xlane.xlu1 %770 }
 0x640   :  { %v775_v28 = vmul.f32 %v771_v27, %v1233_v10 }
 0x642   :  { %v1405_v29 = vsub.f32 %v1394_v24, %v775_v28 }
 0x644   :  { %v779_v0 = vmul.f32 %v1405_v29, %v1405_v29  ;;  %v814_v14 = vmul.f32 %v1066_v50, %v1405_v29  ;;  %v1032_v29 = vld [vmem:[%s1456_s4 + $0x18] sm:$0xff] }
 0x645   :  { %930 = vmatpush.bf16.msra.mxu3 %v1032_v29 }
 0x646   :  { %v781_v30 = vsel %vm46_vm0, %v779_v0, 0.0 }
 0x647   :  { %v774_v31 = vpop.xlane.xlu0 %773  ;;  %782 = vadd.xlane.f32.xlu2 %v781_v30  ;;  %v1067_v30 = vld [vmem:[#allocation2 + $0x5] ss:$0 sm:$0xff] }
 0x648   :  { %v776_v2 = vmul.f32 %v774_v31, %v1233_v10  ;;  %v999_v10 = vld [vmem:[%s1455_s3 + $0x4] sm:$0xf] }
 0x649   :  { %v1000_v41 = vor.u32 %v1027_v39, %v999_v10  ;;  %v1068_v10 = vld [vmem:[#allocation2 + $0x6] ss:$0 sm:$0xff] }
 0x64a   :  { %v1412_v32 = vsub.f32 %v1399_v25, %v776_v2 }
 0x64b   :  { %879 = vmatpush.bf16.msra.mxu2 %v1000_v41 }
 0x64c   :  { %v780_v33 = vmul.f32 %v1412_v32, %v1412_v32  ;;  %v815_v27 = vmul.f32 %v1066_v50, %v1412_v32  ;;  %v1031_v32 = vld [vmem:[%s1456_s4 + $0x10] sm:$0xff] }
 0x64d   :  { %931 = vmatpush.bf16.msra.mxu3 %v1031_v32 }
 0x64e   :  { %v784_v34 = vsel %vm46_vm0, %v780_v33, 0.0 }
 0x64f   :  { %785 = vadd.xlane.f32.xlu1 %v784_v34 }
 0x6ba   :  { %v783_v35 = vpop.xlane.xlu2 %782 }
 0x6bb   :  { %v787_v40 = vmul.f32 0.032258064, %v783_v35 }
 0x6bd   :  { %1112 = vrsqrt.f32 %v787_v40  ;;  %vm796_vm4 = vcmp.eq.f32.partialorder %v787_v40, inf  ;;  %v799_v55 = vand.u32 2147483648, %v787_v40  ;;  %vm798_vm5 = vcmp.eq.f32.partialorder %v787_v40, 0.0 }
 0x6c2   :  { %v786_v42 = vpop.xlane.xlu1 %785 }
 0x6c3   :  { %v1113_v43 = vpop.eup %1112  ;;  %v788_v37 = vmul.f32 0.032258064, %v786_v42 }
 0x6c4   :  { %v790_v44 = vmul.f32 %v1113_v43, %v787_v40 }
 0x6c5   :  { %1114 = vrsqrt.f32 %v788_v37  ;;  %vm808_vm6 = vcmp.eq.f32.partialorder %v788_v37, inf  ;;  %v811_v3 = vand.u32 2147483648, %v788_v37  ;;  %vm810_vm7 = vcmp.eq.f32.partialorder %v788_v37, 0.0 }
 0x6c6   :  { %v791_v45 = vmul.f32 %v1113_v43, %v790_v44  ;;  %v1069_v44 = vld [vmem:[#allocation2 + $0x7] ss:$0 sm:$0xff] }
 0x6c8   :  { %v792_v46 = vmul.f32 0.5, %v791_v45 }
 0x6ca   :  { %v793_v47 = vsub.f32 1.5, %v792_v46 }
 0x6cb   :  { %v1115_v48 = vpop.eup %1114 }
 0x6cc   :  { %v794_v51 = vmul.f32 %v1113_v43, %v793_v47  ;;  %v802_v52 = vmul.f32 %v1115_v48, %v788_v37 }
 0x6ce   :  { %v795_v53 = vmul.f32 %v794_v51, %v787_v40  ;;  %v803_v54 = vmul.f32 %v1115_v48, %v802_v52 }
 0x6d0   :  { %v797_v56 = vsel %vm796_vm4, %v787_v40, %v795_v53  ;;  %v804_v57 = vmul.f32 0.5, %v803_v54  ;;  %v1030_v40 = vld [vmem:[%s1456_s4 + $0x8] sm:$0xff]  ;;  %s948_s4 = sshll.u32 %s1184_s14, 4  ;;  %s949_s4 = int_to_ptr.vmem [resolvable:$true] %s948_s4 }
 0x6d1   :  { %v800_v59 = vsel %vm798_vm5, %v799_v55, %v797_v56  ;;  %932 = vmatpush.bf16.msra.mxu3 %v1030_v40 }
 0x6d2   :  { %v816_v60 = vadd.f32 1e-06, %v800_v59  ;;  %v805_v61 = vsub.f32 1.5, %v804_v57 }
 0x6d4   :  { %1116 = vrcp.f32 %v816_v60  ;;  %v806_v62 = vmul.f32 %v1115_v48, %v805_v61  ;;  %v829_v15 = vand.u32 2147483648, %v816_v60  ;;  %vm823_vm9 = vweird.f32 %v816_v60 }
 0x6d5   :  { %v827_v16 = vand.u32 2147483647, %v816_v60  ;;  %933 = vmatpush.bf16.msra.mxu3 %v1029_v58 }
 0x6d6   :  { %v807_v1 = vmul.f32 %v806_v62, %v788_v37  ;;  %v830_v21 = vor.u32 1.1754944e-38, %v829_v15 }
 0x6d7   :  { %vm828_vm11 = vcmp.eq.f32.partialorder %v827_v16, 8.507059e+37 }
 0x6d8   :  { %v809_v4 = vsel %vm808_vm6, %v788_v37, %v807_v1 }
 0x6d9   :  { %v812_v5 = vsel %vm810_vm7, %v811_v3, %v809_v4 }
 0x6da   :  { %v1117_v6 = vpop.eup %1116  ;;  %v817_v7 = vadd.f32 1e-06, %v812_v5 }
 0x6db   :  { %v819_v8 = vmul.f32 %v1117_v6, %v816_v60  ;;  %vm824_vm8 = vweird.f32 %v1117_v6 }
 0x6dc   :  { %1118 = vrcp.f32 %v817_v7  ;;  %vm825_vm10 = vmor %vm823_vm9, %vm824_vm8  ;;  %v844_v49 = vand.u32 2147483648, %v817_v7  ;;  %v842_v23 = vand.u32 2147483647, %v817_v7  ;;  %vm838_vm13 = vweird.f32 %v817_v7 }
 0x6dd   :  { %v820_v9 = vsub.f32 1.0, %v819_v8 }
 0x6de   :  { %v845_v26 = vor.u32 1.1754944e-38, %v844_v49  ;;  %vm843_vm15 = vcmp.eq.f32.partialorder %v842_v23, 8.507059e+37 }
 0x6df   :  { %v821_v11 = vmul.f32 %v1117_v6, %v820_v9 }
 0x6e1   :  { %v822_v12 = vadd.f32 %v1117_v6, %v821_v11 }
 0x6e2   :  { %v1119_v63 = vpop.eup %1118 }
 0x6e3   :  { %v834_v17 = vmul.f32 %v1119_v63, %v817_v7  ;;  %v826_v19 = vsel %vm825_vm10, %v1117_v6, %v822_v12  ;;  %vm839_vm12 = vweird.f32 %v1119_v63 }
 0x6e4   :  { %v831_v13 = vsel %vm828_vm11, %v830_v21, %v826_v19  ;;  %vm840_vm14 = vmor %vm838_vm13, %vm839_vm12 }
 0x6e5   :  { %v835_v20 = vsub.f32 1.0, %v834_v17  ;;  %v832_v28 = vmul.f32 %v831_v13, %v814_v14 }
 0x6e7   :  { %v836_v22 = vmul.f32 %v1119_v63, %v835_v20  ;;  %v849_v33 = vadd.f32 %v1067_v30, %v832_v28 }
 0x6e9   :  { %v837_v18 = vadd.f32 %v1119_v63, %v836_v22 }
 0x6eb   :  { %v841_v0 = vsel %vm840_vm14, %v1119_v63, %v837_v18 }
 0x6ec   :  { %v846_v31 = vsel %vm843_vm15, %v845_v26, %v841_v0 }
 0x6ed   :  { %v847_v2 = vmul.f32 %v846_v31, %v815_v27 }
 0x6ef   :  { %v850_v34 = vadd.f32 %v1067_v30, %v847_v2 }
 0x6f1   :  { %v851_v35 = vpack.c.bf16 %v850_v34, %v849_v33 }
 0x6f3   :  { %1005 = vmatmul.msk.bf16.vlgmr.msra.gmra.mxu2 %vm46_vm0, %v851_v35 }
 0x776   :  { %v881_v38 = vpop.f32.mrf.mxu2 }
 0x777   :  { %v882_v39 = vadd.f32 %v1068_v10, %v881_v38 }
 0x779   :  { %v886_v42 = vmax.f32 %v882_v39, 0.0 }
 0x77e   :  { %v883_v36 = vpop.f32.mrf.mxu2 }
 0x77f   :  { %v884_v41 = vadd.f32 %v1068_v10, %v883_v36 }
 0x781   :  { %v887_v43 = vmax.f32 %v884_v41, 0.0 }
 0x783   :  { %v888_v37 = vpack.c.bf16 %v887_v43, %v886_v42 }
 0x785   :  { %1022 = vmatmul.msk.bf16.vlgmr.msra.gmra.mxu3 %vm922_vm1, %v888_v37 }
 0x808   :  { %v935_v45 = vpop.f32.mrf.mxu3 }
 0x809   :  { %v936_v46 = vadd.f32 %v1069_v44, %v935_v45 }
 0x80b   :  { %v940_v47 = vadd.f32 %v936_v46, %v1394_v24 }
 0x80d   :  { %942 = vst.msk [vmem:[#allocation5] sm:$0xff] %vm46_vm0, %v940_v47 }
 0x810   :  { %v937_v48 = vpop.f32.mrf.mxu3 }
 0x811   :  { %v938_v51 = vadd.f32 %v1069_v44, %v937_v48 }
 0x813   :  { %v941_v52 = vadd.f32 %v938_v51, %v1399_v25 }
 0x815   :  { %943 = vst.msk [vmem:[#allocation5 + $0x8] sm:$0xff] %vm46_vm0, %v941_v52 }
 0x816   :  { %956 = dma.vmem_to_hbm [thread:$0]  %s949_s4, 256, %s951_s16, [#allocation4], %s1185_s17, %s1185_s17, %s1181_s19  }
 0x817   :  { %1170 = dma.done.wait [#allocation4], 256  }
 0x818   :  { %1171 = vsyncadd [#allocation4], 4294967040 }
 0x819   :  { %961 = vsyncpa [#allocation3], 1 }
 0x81a   :  { %962 = vsyncpa [#allocation4], 1 }

</bundles_post_ra>
